<compile_context>
chip_gen: v7x
topology: tpu7x:2x2x1
jax: 0.10.0
libtpu: 0.0.40
codegen_flags: <defaults>
</compile_context>

<pallas_src>
import jax
import jax.numpy as jnp
from jax.experimental import pallas as pl
from jax.experimental.pallas import tpu as pltpu

N_EMBD = 384
HIDDEN = 4 * N_EMBD  # 1536


# ---------------------------------------------------------------------------
# Kernels
# ---------------------------------------------------------------------------
def _ffn_rows_kernel(x_ref, w1_ref, b1_ref, w2_ref, b2_ref, o_ref):
    """Large-M path: one row tile per grid step, full weights resident.

    x_ref: (tm, C) caller dtype, w1_ref: (C, H) bf16, b1_ref: (1, H) f32,
    w2_ref: (H, C) bf16, b2_ref: (1, C) f32, o_ref: (tm, C) caller dtype.
    """
    xb = x_ref[...].astype(jnp.bfloat16)                       # cast on VPU (slack under MXU)
    h = jnp.dot(xb, w1_ref[...], preferred_element_type=jnp.float32)
    h = jnp.maximum(h + b1_ref[...], 0.0)                      # f32 epilogue (v5e-safe)
    o = jnp.dot(h.astype(jnp.bfloat16), w2_ref[...],
                preferred_element_type=jnp.float32)
    o_ref[...] = (o + b2_ref[...]).astype(o_ref.dtype)         # dropout == identity (eval)


def _ffn_hchunk_kernel(x_ref, w1_ref, b1_ref, w2_ref, b2_ref, o_ref, acc_ref):
    """Small-M (decode) path: H-chunked reduction, f32 accumulator in VMEM.

    x_ref: (tmr, C) resident, w1_ref: (C, th) bf16, b1_ref: (1, th) f32,
    w2_ref: (th, C) bf16, b2_ref: (1, C) f32, o_ref/acc_ref: (tmr, C).
    """
    k = pl.program_id(0)

    @pl.when(k == 0)
    def _():
        acc_ref[...] = jnp.zeros_like(acc_ref)

    xb = x_ref[...].astype(jnp.bfloat16)
    h = jnp.dot(xb, w1_ref[...], preferred_element_type=jnp.float32)
    h = jnp.maximum(h + b1_ref[...], 0.0)
    acc_ref[...] += jnp.dot(h.astype(jnp.bfloat16), w2_ref[...],
                            preferred_element_type=jnp.float32)

    @pl.when(k == pl.num_programs(0) - 1)
    def _():
        o_ref[...] = (acc_ref[...] + b2_ref[...]).astype(o_ref.dtype)


# ---------------------------------------------------------------------------
# Wrapper
# ---------------------------------------------------------------------------
def prepare_params(w1, b1, w2, b2):
    """One-time param prep: bf16 weights (MXU operands), f32 row biases."""
    return (w1.astype(jnp.bfloat16),
            b1.reshape(1, -1).astype(jnp.float32),
            w2.astype(jnp.bfloat16),
            b2.reshape(1, -1).astype(jnp.float32))


def feedforward(x, w1, b1, w2, b2, *, tm=512, th=512, decode_rows=256):
    """x: (B, T, C). Returns (B, T, C) in x.dtype.

    Pass params through prepare_params() once to avoid per-call weight casts.
    """
    B, T, C = x.shape
    H = w1.shape[1]
    assert C % 128 == 0 and H % 128 == 0
    M = B * T
    x2d = x.reshape(M, C)

    # Only cast if the caller did not pre-prepare (no-op for prepared params).
    if w1.dtype != jnp.bfloat16:
        w1 = w1.astype(jnp.bfloat16)
    if w2.dtype != jnp.bfloat16:
        w2 = w2.astype(jnp.bfloat16)
    b1_2d = b1.reshape(1, H).astype(jnp.float32)
    b2_2d = b2.reshape(1, C).astype(jnp.float32)

    out_dtype = x.dtype
    resident = dict(pipeline_mode=pl.Buffered(1))  # constant index map: no double-buffer

    if M <= decode_rows:
        # --- Decode / small-M path: H-chunked weight streaming ------------
        assert H % th == 0
        tmr = max(16, ((M + 15) // 16) * 16)  # bf16 minimum sublane tile is 16
        out2d = pl.pallas_call(
            _ffn_hchunk_kernel,
            out_shape=jax.ShapeDtypeStruct((M, C), out_dtype),
            grid_spec=pltpu.PrefetchScalarGridSpec(
                num_scalar_prefetch=0,
                grid=(H // th,),
                in_specs=[
                    pl.BlockSpec((tmr, C), lambda k: (0, 0), **resident),  # x (resident)
                    pl.BlockSpec((C, th), lambda k: (0, k)),               # W1 H-chunk
                    pl.BlockSpec((1, th), lambda k: (0, k)),               # b1 H-chunk
                    pl.BlockSpec((th, C), lambda k: (k, 0)),               # W2 H-chunk
                    pl.BlockSpec((1, C), lambda k: (0, 0), **resident),    # b2
                ],
                out_specs=pl.BlockSpec((tmr, C), lambda k: (0, 0)),
                scratch_shapes=[pltpu.VMEM((tmr, C), jnp.float32)],
            ),
            compiler_params=pltpu.CompilerParams(
                dimension_semantics=("arbitrary",),   # reduction over H chunks
                vmem_limit_bytes=48 << 20,
            ),
        )(x2d, w1, b1_2d, w2, b2_2d)
    else:
        # --- Large-M path: pipelined row tiles, full weights resident ------
        out2d = pl.pallas_call(
            _ffn_rows_kernel,
            out_shape=jax.ShapeDtypeStruct((M, C), out_dtype),
            grid_spec=pltpu.PrefetchScalarGridSpec(
                num_scalar_prefetch=0,
                grid=(pl.cdiv(M, tm),),               # ragged last block masked by Pallas
                in_specs=[
                    pl.BlockSpec((tm, C), lambda i: (i, 0)),               # x rows (pipelined)
                    pl.BlockSpec((C, H), lambda i: (0, 0), **resident),    # W1 (resident)
                    pl.BlockSpec((1, H), lambda i: (0, 0), **resident),    # b1
                    pl.BlockSpec((H, C), lambda i: (0, 0), **resident),    # W2 (resident)
                    pl.BlockSpec((1, C), lambda i: (0, 0), **resident),    # b2
                ],
                out_specs=pl.BlockSpec((tm, C), lambda i: (i, 0)),
            ),
            compiler_params=pltpu.CompilerParams(
                dimension_semantics=("parallel",),    # row tiles shard across v7x TCs
                vmem_limit_bytes=48 << 20,
            ),
        )(x2d, w1, b1_2d, w2, b2_2d)

    return out2d.reshape(B, T, C)


# ---------------------------------------------------------------------------
# Init + reference + self-test
# ---------------------------------------------------------------------------
def init_params(key, n_embd=N_EMBD):
    """Mimics PyTorch nn.Linear default init: U[-1/sqrt(in), 1/sqrt(in)]."""
    h = 4 * n_embd
    k1, k2, k3, k4 = jax.random.split(key, 4)
    lim1 = 1.0 / jnp.sqrt(n_embd)
    lim2 = 1.0 / jnp.sqrt(h)
    w1 = jax.random.uniform(k1, (n_embd, h), jnp.float32, -lim1, lim1)
    b1 = jax.random.uniform(k2, (h,), jnp.float32, -lim1, lim1)
    w2 = jax.random.uniform(k3, (h, n_embd), jnp.float32, -lim2, lim2)
    b2 = jax.random.uniform(k4, (n_embd,), jnp.float32, -lim2, lim2)
    return w1, b1, w2, b2


def _ref(x, w1, b1, w2, b2):
    C = x.shape[-1]
    x2 = x.reshape(-1, C)
    return (jnp.maximum(x2 @ w1 + b1, 0.0) @ w2 + b2).reshape(x.shape)


if __name__ == "__main__":
    key = jax.random.PRNGKey(0)
    kx, kx2, kp = jax.random.split(key, 3)
    w1, b1, w2, b2 = init_params(kp, N_EMBD)
    pw1, pb1, pw2, pb2 = prepare_params(w1, b1, w2, b2)  # one-time bf16 weight cast

    # Case 1: tiny M (decode-like) -> H-chunked small-M path.
    B, T, C = 2, 8, N_EMBD
    x = jax.random.normal(kx, (B, T, C), jnp.float32)
    out = jax.block_until_ready(feedforward(x, pw1, pb1, pw2, pb2))
    assert out.shape == (B, T, C)
    assert jnp.allclose(out, _ref(x, w1, b1, w2, b2), atol=5e-2, rtol=5e-2)

    # Case 2: M not a multiple of tm -> multi-step row grid with ragged last block.
    B2, T2 = 4, 136  # M = 544 -> grid of 2 row tiles at tm=512, last block masked
    x2 = jax.random.normal(kx2, (B2, T2, C), jnp.float32)
    out2 = jax.block_until_ready(feedforward(x2, pw1, pb1, pw2, pb2))
    assert out2.shape == (B2, T2, C)
    assert jnp.allclose(out2, _ref(x2, w1, b1, w2, b2), atol=5e-2, rtol=5e-2)

    print("KERNEL_OK")
</pallas_src>

<mosaic_0001>
module attributes {stable_mosaic.version = 11 : i64} {
  func.func @_ffn_hchunk_kernel(%arg0: i32, %arg1: memref<16x384xf32, #tpu.memory_space<vmem>>, %arg2: memref<384x512xbf16, #tpu.memory_space<vmem>>, %arg3: memref<1x512xf32, #tpu.memory_space<vmem>>, %arg4: memref<512x384xbf16, #tpu.memory_space<vmem>>, %arg5: memref<1x384xf32, #tpu.memory_space<vmem>>, %arg6: memref<16x384xf32, #tpu.memory_space<vmem>>, %arg7: memref<16x384xf32, #tpu.memory_space<vmem>>) attributes {dimension_semantics = [#tpu.dimension_semantics<arbitrary>], iteration_bounds = array<i64: 3>, scalar_prefetch = 0 : i64, scratch_operands = 1 : i64, tpu.core_type = #tpu.core_type<tc>, window_params = [{pipeline_mode = #tpu.pipeline_mode<synchronous>, transform_indices = @transform_0, window_bounds = array<i64: 16, 384>}, {transform_indices = @transform_1, window_bounds = array<i64: 384, 512>}, {transform_indices = @transform_2, window_bounds = array<i64: 1, 512>}, {transform_indices = @transform_3, window_bounds = array<i64: 512, 384>}, {pipeline_mode = #tpu.pipeline_mode<synchronous>, transform_indices = @transform_4, window_bounds = array<i64: 1, 384>}, {pipeline_mode = #tpu.pipeline_mode<synchronous>, transform_indices = @transform_5, window_bounds = array<i64: 16, 384>}]} {
    %c0_i32 = arith.constant 0 : i32
    %0 = arith.cmpi eq, %arg0, %c0_i32 : i32
    %1 = arith.extui %0 : i1 to i32
    %c0_i32_0 = arith.constant 0 : i32
    %2 = arith.cmpi ne, %1, %c0_i32_0 : i32
    scf.if %2 {
      %cst_15 = arith.constant 0.000000e+00 : f32
      %21 = vector.broadcast %cst_15 : f32 to vector<16x384xf32>
      %c0_16 = arith.constant 0 : index
      %c0_17 = arith.constant 0 : index
      %22 = vector.load %arg7[%c0_16, %c0_17] : memref<16x384xf32, #tpu.memory_space<vmem>>, vector<16x384xf32>
      tpu.vector_store %arg7[%c0_16, %c0_17], %21 {strides = array<i32>} : memref<16x384xf32, #tpu.memory_space<vmem>>, vector<16x384xf32>,
    } else {
    }
    %c0 = arith.constant 0 : index
    %c0_1 = arith.constant 0 : index
    %3 = vector.load %arg1[%c0, %c0_1] : memref<16x384xf32, #tpu.memory_space<vmem>>, vector<16x384xf32>
    %4 = arith.truncf %3 : vector<16x384xf32> to vector<16x384xbf16>
    %c0_2 = arith.constant 0 : index
    %c0_3 = arith.constant 0 : index
    %5 = vector.load %arg2[%c0_2, %c0_3] : memref<384x512xbf16, #tpu.memory_space<vmem>>, vector<384x512xbf16>
    %cst = arith.constant dense<0.000000e+00> : vector<16x512xf32>
    %6 = tpu.matmul %4, %5, %cst {dimension_numbers = #tpu.dot_dimension_numbers<[1], [0], [0], [1], [0, 0, 1, 1], [], []>} : vector<16x384xbf16>, vector<384x512xbf16>, vector<16x512xf32> -> vector<16x512xf32>
    %c0_4 = arith.constant 0 : index
    %c0_5 = arith.constant 0 : index
    %7 = vector.load %arg3[%c0_4, %c0_5] : memref<1x512xf32, #tpu.memory_space<vmem>>, vector<1x512xf32>
    %8 = vector.broadcast %7 : vector<1x512xf32> to vector<16x512xf32>
    %9 = arith.addf %6, %8 : vector<16x512xf32>
    %cst_6 = arith.constant 0.000000e+00 : f32
    %10 = vector.broadcast %cst_6 : f32 to vector<16x512xf32>
    %11 = arith.maximumf %9, %10 : vector<16x512xf32>
    %c0_7 = arith.constant 0 : index
    %c0_8 = arith.constant 0 : index
    %12 = vector.load %arg7[%c0_7, %c0_8] : memref<16x384xf32, #tpu.memory_space<vmem>>, vector<16x384xf32>
    %13 = arith.truncf %11 : vector<16x512xf32> to vector<16x512xbf16>
    %c0_9 = arith.constant 0 : index
    %c0_10 = arith.constant 0 : index
    %14 = vector.load %arg4[%c0_9, %c0_10] : memref<512x384xbf16, #tpu.memory_space<vmem>>, vector<512x384xbf16>
    %cst_11 = arith.constant dense<0.000000e+00> : vector<16x384xf32>
    %15 = tpu.matmul %13, %14, %cst_11 {dimension_numbers = #tpu.dot_dimension_numbers<[1], [0], [0], [1], [0, 0, 1, 1], [], []>} : vector<16x512xbf16>, vector<512x384xbf16>, vector<16x384xf32> -> vector<16x384xf32>
    %16 = arith.addf %12, %15 : vector<16x384xf32>
    %c0_12 = arith.constant 0 : index
    %c0_13 = arith.constant 0 : index
    %17 = vector.load %arg7[%c0_12, %c0_13] : memref<16x384xf32, #tpu.memory_space<vmem>>, vector<16x384xf32>
    tpu.vector_store %arg7[%c0_12, %c0_13], %16 {strides = array<i32>} : memref<16x384xf32, #tpu.memory_space<vmem>>, vector<16x384xf32>,
    %c2_i32 = arith.constant 2 : i32
    %18 = arith.cmpi eq, %arg0, %c2_i32 : i32
    %19 = arith.extui %18 : i1 to i32
    %c0_i32_14 = arith.constant 0 : i32
    %20 = arith.cmpi ne, %19, %c0_i32_14 : i32
    scf.if %20 {
      %c0_15 = arith.constant 0 : index
      %c0_16 = arith.constant 0 : index
      %21 = vector.load %arg7[%c0_15, %c0_16] : memref<16x384xf32, #tpu.memory_space<vmem>>, vector<16x384xf32>
      %c0_17 = arith.constant 0 : index
      %c0_18 = arith.constant 0 : index
      %22 = vector.load %arg5[%c0_17, %c0_18] : memref<1x384xf32, #tpu.memory_space<vmem>>, vector<1x384xf32>
      %23 = vector.broadcast %22 : vector<1x384xf32> to vector<16x384xf32>
      %24 = arith.addf %21, %23 : vector<16x384xf32>
      %c0_19 = arith.constant 0 : index
      %c0_20 = arith.constant 0 : index
      %25 = vector.load %arg6[%c0_19, %c0_20] : memref<16x384xf32, #tpu.memory_space<vmem>>, vector<16x384xf32>
      tpu.vector_store %arg6[%c0_19, %c0_20], %24 {strides = array<i32>} : memref<16x384xf32, #tpu.memory_space<vmem>>, vector<16x384xf32>,
    } else {
    }
    return
  }
  func.func @transform_0(%arg0: i32) -> (i32, i32) {
    %c0_i32 = arith.constant 0 : i32
    %c0_i32_0 = arith.constant 0 : i32
    %c0_i32_1 = arith.constant 0 : i32
    return %c0_i32, %c0_i32_0 : i32, i32
  }
  func.func @transform_1(%arg0: i32) -> (i32, i32) {
    %c0_i32 = arith.constant 0 : i32
    %c0_i32_0 = arith.constant 0 : i32
    return %c0_i32, %arg0 : i32, i32
  }
  func.func @transform_2(%arg0: i32) -> (i32, i32) {
    %c0_i32 = arith.constant 0 : i32
    %c0_i32_0 = arith.constant 0 : i32
    return %c0_i32, %arg0 : i32, i32
  }
  func.func @transform_3(%arg0: i32) -> (i32, i32) {
    %c0_i32 = arith.constant 0 : i32
    %c0_i32_0 = arith.constant 0 : i32
    return %arg0, %c0_i32 : i32, i32
  }
  func.func @transform_4(%arg0: i32) -> (i32, i32) {
    %c0_i32 = arith.constant 0 : i32
    %c0_i32_0 = arith.constant 0 : i32
    %c0_i32_1 = arith.constant 0 : i32
    return %c0_i32, %c0_i32_0 : i32, i32
  }
  func.func @transform_5(%arg0: i32) -> (i32, i32) {
    %c0_i32 = arith.constant 0 : i32
    %c0_i32_0 = arith.constant 0 : i32
    %c0_i32_1 = arith.constant 0 : i32
    return %c0_i32, %c0_i32_0 : i32, i32
  }
}

</mosaic_0001>

<bundles_post_ra>
// kernel: tpu_custom_call.1
= control target key start
LH: loop header
LB: loop body
LE: loop exit
PB: predicated region body
PF: predicated region fallthrough
CT: control target
= control target key end

     0   :  { %s3550_s0 = inlined_call_operand.hbm [shape: f32[16,384], index: 0, kind: input, shape index: {}]   ;;  %s3551_s1 = inlined_call_operand.hbm [shape: bf16[384,1536], index: 1, kind: input, shape index: {}]   ;;  %s3552_s2 = inlined_call_operand.hbm [shape: f32[1,1536], index: 2, kind: input, shape index: {}]   ;;  %s3553_s3 = inlined_call_operand.hbm [shape: bf16[1536,384], index: 3, kind: input, shape index: {}]   ;;  %s3554_s4 = inlined_call_operand.hbm [shape: f32[1,384], index: 4, kind: input, shape index: {}]   ;;  %s3555_s5 = inlined_call_operand.hbm [shape: f32[16,384], index: 5, kind: output, shape index: {}]  }
   0x1   :  { %3568 = sst [smem:[#allocation18_spill]] %s3551_s1 }
   0x2   :  { %3569 = sst [smem:[#allocation19_spill]] %s3554_s4 }
   0x3   :  { %10 = vsyncpa [#allocation4], 0 }
   0x4   :  { %11 = vsyncpa [#allocation7], 0 }
   0x5   :  { %13 = vsyncpa [#allocation7 + $0x1], 0 }
   0x6   :  { %14 = vsyncpa [#allocation10], 0 }
   0x7   :  { %16 = vsyncpa [#allocation10 + $0x1], 0 }
   0x8   :  { %17 = vsyncpa [#allocation5], 0  ;;  %s3043_s18 = smov 0   ;;  %s3045_s19 = smov 0  }
   0x9   :  { %s3047_s20 = smov 0   ;;  %s3049_s21 = smov 0  }
   0xa LB: > { %s3062_s22 = sadd.s32 4294967295, %s2994_s21   ;;  %s3065_s23 = sadd.s32 1, %s2994_s21   ;;  %s2994_s21 = sphi %s3049_s21, %s3596_s21   ;;  %s2990_s20 = sphi %s3047_s20, %s3595_s20   ;;  %s2986_s19 = sphi %s3045_s19, %s3594_s19   ;;  %s2982_s18 = sphi %s3043_s18, %s3593_s18  }
   0xb   : > { %s48_s24 = ssub.s32 %s2994_s21, %s3065_s23  ;;  %s51_s25 = sadd.s32 1, %s2990_s20 }
   0xc   : > { %p49_p0 = scmp.eq.s32.totalorder %s48_s24, 0  ;;  %p58_p1 = scmp.ne.s32.totalorder %s2990_s20, %s2986_s19 }
   0xd   : > { %p59_p2 = scmp.eq.s32.totalorder %s2994_s21, 0  ;;  %p64_p3 = scmp.ne.s32.totalorder %s2986_s19, %s2982_s18 }
   0xe   : > { %s3075_s26 = scalar_select %p49_p0, %s2990_s20, %s51_s25  }
   0xf   : > { %p3077_p4 = por %p59_p2, %p58_p1  ;;  %p3556_p5 = scmp.eq.s32.totalorder %s3062_s22, 0 }
  0x10   : > { %p2128_p6 = scmp.ge.s32.totalorder %s2994_s21, 1  ;;  %p169_p7 = scmp.lt.s32.totalorder %s2994_s21, 4 }
  0x11   : > { %p3086_p8 = por %p3556_p5, %p64_p3  ;;  %s2996_s30 = smov [#allocation11]  }
  0x12   : > { %p3091_p10 = pnand %p2128_p6, %p169_p7  ;;  %s195_s6 = sshll.u32 %s2996_s30, 4  ;;  %s196_s6 = int_to_ptr.vmem [resolvable:$true] %s195_s6 }
  0x13   : > { %s3571_s28 = scalar_select %p3086_p8, 1, 0 }
  0x14   : > { %s3572_s29 = scalar_select %p3091_p10, 1, 0 }
  0x15   : > { %p2430_p11 = pneg %p3091_p10  ;;  %p2449_p12 = scmp.lt.s32.totalorder %s2994_s21, 3 }
  0x16   : > { %s3563_s7 = sand.u32 1, %s2994_s21   ;;  %s3564_s10 = sand.u32 1, %s2990_s20  }
  0x17   : > { %p3101_p13 = pnand %p2430_p11, %p3556_p5  ;;  %p3107_p0 = pnand %p2449_p12, %p3077_p4 }
  0x18   : > { %s3114_s11 = smul.u32 768, %s3564_s10  ;;  %s3575_s4 = sld [smem:[#allocation19_spill]] }
  0x19   : > { %s3573_s8 = scalar_select %p3101_p13, 1, 0 }
  0x1a   : > { %s3574_s9 = scalar_select %p3107_p0, 1, 0 }
  0x1b   : > { %p3560_p2 = pneg %p3101_p13 }
  0x1e   : > { %s2772_s14 = scalar_lea.hbm %s3575_s4, 48 }
  0x1f   : > { %p2773_p1 = scmp.ne.s32.totalorder %s3575_s4, %s2772_s14  ;;  %p2779_p6 = scmp.lt.u32.totalorder %s2772_s14, %s3575_s4 }
  0x21   : > { %p2775_p3 = pnand %p3560_p2, %p2773_p1 }
  0x23   : > { %p2776_p4 = pneg %p2775_p3 }
  0x25   : > { %p2781_p7 = pnand %p2779_p6, %p2776_p4 }
  0x27   : > { %2784 = shalt.err (!%p2781_p7)
}
  0x28   : > { %s2785_s24 = scalar_lea.vmem %s196_s6, 48  ;;  %s2792_s25 = scalar_lea.vmem %s196_s6, 64 }
  0x29   : > { %p2786_p11 = scmp.ne.s32.totalorder %s196_s6, %s2785_s24  ;;  %p2793_p5 = scmp.lt.s32.totalorder %s196_s6, %s196_s6 }
  0x2a   : > { %p2794_p8 = scmp.lt.s32.totalorder %s2792_s25, %s2785_s24 }
  0x2b   : > { %p2788_p12 = pnand %p2786_p11, %p3560_p2 }
  0x2c   : > { %p2795_p10 = por %p2794_p8, %p2793_p5 }
  0x2d   : > { %p2789_p9 = pneg %p2788_p12 }
  0x2f   : > { %p2796_p0 = pnand %p2795_p10, %p2789_p9 }
  0x31   : > { %2799 = shalt.err (!%p2796_p0)
}
  0x32   : > { %2436 = dma.hbm_to_vmem [thread:$0]  (!%p3101_p13), %s3575_s4, 48, %s196_s6, [#allocation10]  }
  0x33   : > { %s2342_s12 = sshll.u32 %s2994_s21, 8  ;;  %s210_s13 = scalar_lea.vmem [#allocation6], %s3114_s11 }
  0x34   : > { %s217_s14 = sshll.u32 %s210_s13, 4  ;;  %s3576_s1 = sld [smem:[#allocation18_spill]]  ;;  %s3145_s14 = int_to_ptr.vmem [resolvable:$true] %s217_s14 }
  0x35   : > { %s3149_s18 = scalar_lea.sflag [#allocation7], %s3563_s7  ;;  %p3577_p8 = scmp.ne.s32.totalorder %s3574_s9, 0 }
  0x37   : > { %p3155_p9 = pneg %p3577_p8 }
  0x39   : > { %s3578_s6 = scalar_select %p3155_p9, 1, 0 }
  0x3a   : > { %s3143_s17 = scalar_lea.hbm %s3576_s1, %s2342_s12  ;;  %s2805_s30 = scalar_lea.hbm %s3576_s1, 36864 }
  0x3b   : > { %s2800_s24 = scalar_lea.hbm %s3143_s17, 12288  ;;  %p2806_p1 = scmp.lt.u32.totalorder %s3143_s17, %s3576_s1 }
  0x3c   : > { %p2801_p5 = scmp.ne.s32.totalorder %s3143_s17, %s2800_s24  ;;  %p2807_p3 = scmp.lt.u32.totalorder %s2805_s30, %s2800_s24 }
  0x3d   : > { %p2809_p6 = scmp.lt.u32.totalorder %s2800_s24, %s3143_s17 }
  0x3e   : > { %p2803_p10 = pnand %p3155_p9, %p2801_p5  ;;  %p2808_p4 = por %p2807_p3, %p2806_p1 }
  0x40   : > { %p2804_p0 = pneg %p2803_p10  ;;  %p2810_p7 = por %p2809_p6, %p2808_p4 }
  0x42   : > { %p2811_p11 = pnand %p2810_p7, %p2804_p0 }
  0x44   : > { %2814 = shalt.err (!%p2811_p11)
}
  0x45   : > { %s2815_s15 = scalar_lea.vmem %s3145_s14, 12288  ;;  %s2997_s16 = smov [#allocation6]  }
  0x46   : > { %p2816_p12 = scmp.ne.s32.totalorder %s3145_s14, %s2815_s15  ;;  %s2820_s25 = sshll.u32 %s2997_s16, 4  ;;  %s2821_s25 = int_to_ptr.vmem [resolvable:$false] %s2820_s25 }
  0x47   : > { %s2822_s27 = scalar_lea.vmem %s2821_s25, 24576  ;;  %p2823_p2 = scmp.lt.s32.totalorder %s3145_s14, %s2821_s25 }
  0x48   : > { %p2818_p5 = pnand %p2816_p12, %p3155_p9  ;;  %p2824_p13 = scmp.lt.s32.totalorder %s2822_s27, %s2815_s15 }
  0x4a   : > { %p2819_p10 = pneg %p2818_p5  ;;  %p2825_p1 = por %p2824_p13, %p2823_p2 }
  0x4c   : > { %p2826_p3 = pnand %p2825_p1, %p2819_p10 }
  0x4e   : > { %2829 = shalt.err (!%p2826_p3)
}
  0x4f   : > { %s2998_s24 = smov 768   ;;  %s2999_s30 = smov 256  }
  0x50   : > { %s3000_s12 = smov 16   ;;  %s3001_s13 = smov [#allocation3]  }
  0x51   : > { %2440 = dma.hbm_to_vmem [thread:$0]  (!%p3577_p8), %s3143_s17, 12288, %s3145_s14, %s3149_s18, %s2998_s24, %s2999_s30, %s3000_s12  }
  0x52   : > { %s181_s7 = sshll.u32 %s3001_s13, 4  ;;  %s2830_s15 = scalar_lea.hbm %s3550_s0, 768  ;;  %s182_s7 = int_to_ptr.vmem [resolvable:$true] %s181_s7 }
  0x53   : > { %p2831_p13 = scmp.ne.s32.totalorder %s3550_s0, %s2830_s15  ;;  %p3579_p2 = scmp.ne.s32.totalorder %s3573_s8, 0 }
  0x54   : > { %p2837_p7 = scmp.lt.u32.totalorder %s2830_s15, %s3550_s0 }
  0x55   : > { %p3580_p0 = pneg %p3579_p2 }
  0x57   : > { %p2833_p4 = pnand %p2831_p13, %p3580_p0 }
  0x59   : > { %p2834_p6 = pneg %p2833_p4 }
  0x5b   : > { %p2839_p11 = pnand %p2837_p7, %p2834_p6 }
  0x5d   : > { %2842 = shalt.err (!%p2839_p11)
}
  0x5e   : > { %s2843_s14 = scalar_lea.vmem %s182_s7, 768  ;;  %p3581_p5 = pmov %p3580_p0 }
  0x5f   : > { %p2844_p12 = scmp.ne.s32.totalorder %s182_s7, %s2843_s14  ;;  %p2851_p3 = scmp.lt.s32.totalorder %s182_s7, %s182_s7 }
  0x60   : > { %p2852_p8 = scmp.lt.s32.totalorder %s2843_s14, %s2843_s14 }
  0x61   : > { %p2846_p10 = pnand %p2844_p12, %p3581_p5 }
  0x62   : > { %p2853_p9 = por %p2852_p8, %p2851_p3 }
  0x63   : > { %p2847_p1 = pneg %p2846_p10 }
  0x65   : > { %p2854_p0 = pnand %p2853_p9, %p2847_p1 }
  0x67   : > { %2857 = shalt.err (!%p2854_p0)
}
  0x68   : > { %s3002_s10 = smov 384   ;;  %s3003_s1 = smov 24  }
  0x69   : > { %2433 = dma.hbm_to_vmem [thread:$0]  (!%p3579_p2), %s3550_s0, 768, %s182_s7, [#allocation4], %s3002_s10, %s3002_s10, %s3003_s1  }
  0x6a   : > { %s3582_s24 = sand.u32 1, %s2990_s20   ;;  %s2343_s12 = sshll.u32 %s2994_s21, 6 }
  0x6b   : > { %s2134_s30 = sshll.u32 %s3582_s24, 2  ;;  %s3205_s15 = scalar_lea.hbm %s3552_s2, %s2343_s12 }
  0x6c   : > { %s231_s25 = scalar_lea.vmem [#allocation8], %s2134_s30  ;;  %s2858_s8 = scalar_lea.hbm %s3205_s15, 64 }
  0x6d   : > { %s239_s27 = sshll.u32 %s231_s25, 4  ;;  %p2859_p8 = scmp.ne.s32.totalorder %s3205_s15, %s2858_s8  ;;  %s240_s27 = int_to_ptr.vmem [resolvable:$true] %s239_s27 }
  0x6e   : > { %p3583_p9 = scmp.ne.s32.totalorder %s3578_s6, 0  ;;  %s2863_s10 = scalar_lea.hbm %s3552_s2, 192 }
  0x6f   : > { %p2864_p4 = scmp.lt.u32.totalorder %s3205_s15, %s3552_s2  ;;  %p2865_p6 = scmp.lt.u32.totalorder %s2863_s10, %s2858_s8 }
  0x70   : > { %p2861_p13 = pnand %p2859_p8, %p3583_p9  ;;  %p2867_p11 = scmp.lt.u32.totalorder %s2858_s8, %s3205_s15 }
  0x71   : > { %p2866_p7 = por %p2865_p6, %p2864_p4 }
  0x72   : > { %p2862_p2 = pneg %p2861_p13 }
  0x73   : > { %p2868_p12 = por %p2867_p11, %p2866_p7 }
  0x75   : > { %p2869_p5 = pnand %p2868_p12, %p2862_p2 }
  0x77   : > { %2872 = shalt.err (!%p2869_p5)
}
  0x78   : > { %s2873_s17 = scalar_lea.vmem %s240_s27, 64  ;;  %s3004_s24 = smov [#allocation8]  }
  0x79   : > { %p2874_p10 = scmp.ne.s32.totalorder %s240_s27, %s2873_s17  ;;  %s2878_s30 = sshll.u32 %s3004_s24, 4  ;;  %s2879_s30 = int_to_ptr.vmem [resolvable:$false] %s2878_s30 }
  0x7a   : > { %s2880_s12 = scalar_lea.vmem %s2879_s30, 128  ;;  %p2881_p0 = scmp.lt.s32.totalorder %s240_s27, %s2879_s30 }
  0x7b   : > { %p2876_p1 = pnand %p2874_p10, %p3583_p9  ;;  %p2882_p8 = scmp.lt.s32.totalorder %s2880_s12, %s2873_s17 }
  0x7d   : > { %p2877_p3 = pneg %p2876_p1  ;;  %p2883_p13 = por %p2882_p8, %p2881_p0 }
  0x7f   : > { %p2884_p4 = pnand %p2883_p13, %p2877_p3 }
  0x81   : > { %2887 = shalt.err (!%p2884_p4)
}
  0x82   : > { %p3584_p6 = scmp.ne.s32.totalorder %s3574_s9, 0  ;;  %s2410_s13 = smul.u32 12288, %s2994_s21 }
  0x83   : > { %s250_s16 = scalar_lea.vmem [#allocation9], %s3114_s11  ;;  %s3585_s10 = sand.u32 1, %s2994_s21  }
  0x84   : > { %2443 = dma.hbm_to_vmem [thread:$0]  (!%p3584_p6), %s3205_s15, 64, %s240_s27, %s3149_s18  }
  0x85   : > { %s258_s25 = sshll.u32 %s250_s16, 4  ;;  %s3232_s14 = scalar_lea.hbm %s3553_s3, %s2410_s13  ;;  %s3227_s25 = int_to_ptr.vmem [resolvable:$true] %s258_s25 }
  0x86   : > { %s3236_s1 = scalar_lea.sflag [#allocation10], %s3585_s10  ;;  %s2888_s4 = scalar_lea.hbm %s3232_s14, 12288 }
  0x87   : > { %p2889_p2 = scmp.ne.s32.totalorder %s3232_s14, %s2888_s4  ;;  %s2893_s15 = scalar_lea.hbm %s3553_s3, 36864 }
  0x88   : > { %p2894_p12 = scmp.lt.u32.totalorder %s3232_s14, %s3553_s3  ;;  %p2895_p5 = scmp.lt.u32.totalorder %s2893_s15, %s2888_s4 }
  0x89   : > { %p2891_p7 = pnand %p2889_p2, %p3583_p9  ;;  %p2897_p1 = scmp.lt.u32.totalorder %s2888_s4, %s3232_s14 }
  0x8a   : > { %p2896_p10 = por %p2895_p5, %p2894_p12 }
  0x8b   : > { %p2892_p11 = pneg %p2891_p7 }
  0x8c   : > { %p2898_p3 = por %p2897_p1, %p2896_p10 }
  0x8e   : > { %p2899_p0 = pnand %p2898_p3, %p2892_p11 }
  0x90   : > { %2902 = shalt.err (!%p2899_p0)
}
  0x91   : > { %s2903_s21 = scalar_lea.vmem %s3227_s25, 12288  ;;  %s3005_s24 = smov [#allocation9]  }
  0x92   : > { %p2904_p8 = scmp.ne.s32.totalorder %s3227_s25, %s2903_s21  ;;  %s2908_s30 = sshll.u32 %s3005_s24, 4  ;;  %s2909_s30 = int_to_ptr.vmem [resolvable:$false] %s2908_s30 }
  0x93   : > { %s2910_s12 = scalar_lea.vmem %s2909_s30, 24576  ;;  %p2911_p2 = scmp.lt.s32.totalorder %s3227_s25, %s2909_s30 }
  0x94   : > { %p2906_p13 = pnand %p2904_p8, %p3583_p9  ;;  %p2912_p7 = scmp.lt.s32.totalorder %s2910_s12, %s2903_s21 }
  0x96   : > { %p2907_p4 = pneg %p2906_p13  ;;  %p2913_p12 = por %p2912_p7, %p2911_p2 }
  0x98   : > { %p2914_p5 = pnand %p2913_p12, %p2907_p4 }
  0x9a   : > { %2917 = shalt.err (!%p2914_p5)
}
  0x9b   : > { %s3006_s13 = smov 192   ;;  %s3007_s16 = smov 12  }
  0x9c   : > { %2446 = dma.hbm_to_vmem [thread:$0]  (!%p3584_p6), %s3232_s14, 12288, %s3227_s25, %s3236_s1, %s3006_s13, %s3006_s13, %s3007_s16  }
  0x9d   : > { %p3586_p9 = scmp.ne.s32.totalorder %s3572_s29, 0 }
  0x9e   : > { %p3587_p11 = scmp.eq.s32.totalorder (!%p3586_p9), %s3062_s22, 0 }
  0x9f   : > { %270 = sbr.rel (%p3586_p9) target bundleno = 797 (0x31d), region = 40 }
  0xa6   : > { %2961 = dma.done.wait (%p3587_p11), [#allocation4], 768   ;;  %p3588_p10 = pmov %p3587_p11 }
  0xa7   : > { %s276_s6 = sand.u32 1, %s3062_s22   ;;  %s278_s8 = sand.u32 1, %s2986_s19  }
  0xa8   : > { %2963 = vsyncadd (%p3588_p10), [#allocation4], 4294966528  ;;  %s2411_s7 = smul.u32 768, %s278_s8  ;;  %s277_s10 = scalar_lea.sflag [#allocation7], %s276_s6 }
  0xa9   : > { %p3589_p1 = scmp.ne.s32.totalorder %s3571_s28, 0 }
  0xaa   : > { %s3268_s4 = scalar_lea.vmem [#allocation6], %s2411_s7 }
  0xab   : > { %2965 = dma.done.wait (%p3589_p1), %s277_s10, 12352  }
  0xac   : > { %2967 = vsyncadd (%p3589_p1), %s277_s10, 4294954944  ;;  %s3274_s29 = sshll.u32 %s278_s8, 2  ;;  %s295_s25 = scalar_lea.sflag [#allocation10], %s276_s6 }
  0xad   : > { %s289_s9 = scalar_lea.vmem [#allocation8], %s3274_s29  ;;  %s3277_s14 = scalar_lea.vmem [#allocation9], %s2411_s7 }
  0xae   : > { %2969 = dma.done.wait (%p3589_p1), %s295_s25, 12288  }
  0xaf   : > { %2971 = vsyncadd (%p3589_p1), %s295_s25, 4294955008  ;;  %p3590_p6 = pmov %p3588_p10 }
  0xb1   : > { %2973 = dma.done.wait (%p3590_p6), [#allocation10], 48   ;;  %p3591_p3 = pmov %p3590_p6 }
  0xb2   : > { %p3592_p0 = scmp.ne.s32.totalorder %s3062_s22, 0 }
  0xb3   : > { %2975 = vsyncadd (%p3591_p3), [#allocation10], 4294967248  ;;  %v3008_v0 = vmov (!%p3592_p0), 0.0  }
  0xb4   : > { %341 = sbr.rel (%p3592_p0) target bundleno = 187 (0xbb), region = 64  ;;  %342 = vst [vmem:[#allocation2] sm:$0xff] (!%p3592_p0), %v3008_v0  ;;  %343 = vst [vmem:[#allocation2 + $0x8] sm:$0xff] (!%p3592_p0), %v3008_v0 }
  0xb5   : > { %344 = vst [vmem:[#allocation2 + $0x10] sm:$0xff] (!%p3592_p0), %v3008_v0  ;;  %345 = vst [vmem:[#allocation2 + $0x18] sm:$0xff] (!%p3592_p0), %v3008_v0 }
  0xb6   : > { %346 = vst [vmem:[#allocation2 + $0x20] sm:$0xff] (!%p3592_p0), %v3008_v0  ;;  %347 = vst [vmem:[#allocation2 + $0x28] sm:$0xff] (!%p3592_p0), %v3008_v0 }
  0xbb PF: > { %v2500_v1 = vld [vmem:[%s3268_s4 + $0x4] ss:$16 sps:$4 sm:$0xff]   ;;  %v3009_v3 = vmov 0   ;;  %v2504_v4 = vld [vmem:[%s3268_s4] ss:$16 sps:$4 sm:$0xff]   ;;  %v353_v35 = vld [vmem:[#allocation3 + $0x28] sm:$0xff] }
  0xbc   : > { %v2502_v2 = vld [vmem:[%s3268_s4 + $0x204] ss:$16 sps:$4 sm:$0xff]   ;;  %1030 = vmatprep.mubr.bf16.mxu1 %v3009_v3  ;;  %955 = vmatprep.subr.bf16.mxu0 %v2500_v1  ;;  %v2505_v5 = vld [vmem:[%s3268_s4 + $0x200] ss:$16 sps:$4 sm:$0xff]   ;;  %v2552_v37 = vld [vmem:[%s3268_s4 + $0xc] ss:$16 sps:$4 sm:$0xff]  }
  0xbd   : > { %998 = vmatprep.subr.bf16.mxu1 %v2502_v2  ;;  %v2506_v6 = vld [vmem:[%s3268_s4 + $0x24] ss:$16 sps:$4 sm:$0xff]   ;;  %956 = vmatpush1.bf16.msra.mxu0 %v2504_v4  ;;  %v2510_v8 = vld [vmem:[%s3268_s4 + $0x20] ss:$16 sps:$4 sm:$0xff]   ;;  %v2550_v39 = vld [vmem:[%s3268_s4 + $0x8] ss:$16 sps:$4 sm:$0xff]  }
  0xbe   : > { %999 = vmatpush1.bf16.msra.mxu1 %v2505_v5  ;;  %v2508_v7 = vld [vmem:[%s3268_s4 + $0x224] ss:$16 sps:$4 sm:$0xff]   ;;  %957 = vmatprep.subr.bf16.mxu0 %v2506_v6  ;;  %v2511_v9 = vld [vmem:[%s3268_s4 + $0x220] ss:$16 sps:$4 sm:$0xff]   ;;  %v2558_v42 = vld [vmem:[%s3268_s4 + $0x2c] ss:$16 sps:$4 sm:$0xff]  }
  0xbf   : > { %1000 = vmatprep.subr.bf16.mxu1 %v2508_v7  ;;  %v2512_v10 = vld [vmem:[%s3268_s4 + $0x44] ss:$16 sps:$4 sm:$0xff]   ;;  %v2516_v12 = vld [vmem:[%s3268_s4 + $0x40] ss:$16 sps:$4 sm:$0xff]   ;;  %v2556_v43 = vld [vmem:[%s3268_s4 + $0x28] ss:$16 sps:$4 sm:$0xff]  }
  0xc0   : > { %v2514_v11 = vld [vmem:[%s3268_s4 + $0x244] ss:$16 sps:$4 sm:$0xff]   ;;  %v2517_v13 = vld [vmem:[%s3268_s4 + $0x240] ss:$16 sps:$4 sm:$0xff]   ;;  %v2564_v46 = vld [vmem:[%s3268_s4 + $0x4c] ss:$16 sps:$4 sm:$0xff]  }
  0xc1   : > { %958 = vmatpush1.bf16.msra.mxu0 %v2510_v8  ;;  %v2518_v14 = vld [vmem:[%s3268_s4 + $0x64] ss:$16 sps:$4 sm:$0xff]   ;;  %v2522_v16 = vld [vmem:[%s3268_s4 + $0x60] ss:$16 sps:$4 sm:$0xff]   ;;  %v2562_v47 = vld [vmem:[%s3268_s4 + $0x48] ss:$16 sps:$4 sm:$0xff]  }
  0xc2   : > { %1001 = vmatpush1.bf16.msra.mxu1 %v2511_v9  ;;  %959 = vmatprep.subr.bf16.mxu0 %v2512_v10  ;;  %v2520_v15 = vld [vmem:[%s3268_s4 + $0x264] ss:$16 sps:$4 sm:$0xff]   ;;  %v2523_v17 = vld [vmem:[%s3268_s4 + $0x260] ss:$16 sps:$4 sm:$0xff]   ;;  %v2570_v50 = vld [vmem:[%s3268_s4 + $0x6c] ss:$16 sps:$4 sm:$0xff]  }
  0xc3   : > { %1002 = vmatprep.subr.bf16.mxu1 %v2514_v11  ;;  %v2524_v18 = vld [vmem:[%s3268_s4 + $0x84] ss:$16 sps:$4 sm:$0xff]   ;;  %v2528_v20 = vld [vmem:[%s3268_s4 + $0x80] ss:$16 sps:$4 sm:$0xff]   ;;  %v349_v51 = vld [vmem:[#allocation3 + $0x8] sm:$0xff]  ;;  %p2337_p8 = scmp.ne.s32.totalorder %s3062_s22, 2 }
  0xc4   : > { %v2526_v19 = vld [vmem:[%s3268_s4 + $0x284] ss:$16 sps:$4 sm:$0xff]   ;;  %v2529_v21 = vld [vmem:[%s3268_s4 + $0x280] ss:$16 sps:$4 sm:$0xff]   ;;  %v2568_v53 = vld [vmem:[%s3268_s4 + $0x68] ss:$16 sps:$4 sm:$0xff]  }
  0xc5   : > { %960 = vmatpush1.bf16.msra.mxu0 %v2516_v12  ;;  %v2530_v22 = vld [vmem:[%s3268_s4 + $0xa4] ss:$16 sps:$4 sm:$0xff]   ;;  %v2534_v24 = vld [vmem:[%s3268_s4 + $0xa0] ss:$16 sps:$4 sm:$0xff]   ;;  %v2576_v57 = vld [vmem:[%s3268_s4 + $0x8c] ss:$16 sps:$4 sm:$0xff]  }
  0xc6   : > { %1003 = vmatpush1.bf16.msra.mxu1 %v2517_v13  ;;  %961 = vmatprep.subr.bf16.mxu0 %v2518_v14  ;;  %v2532_v23 = vld [vmem:[%s3268_s4 + $0x2a4] ss:$16 sps:$4 sm:$0xff]   ;;  %v2535_v25 = vld [vmem:[%s3268_s4 + $0x2a0] ss:$16 sps:$4 sm:$0xff]   ;;  %v2574_v58 = vld [vmem:[%s3268_s4 + $0x88] ss:$16 sps:$4 sm:$0xff]  }
  0xc7   : > { %1004 = vmatprep.subr.bf16.mxu1 %v2520_v15  ;;  %v2536_v26 = vld [vmem:[%s3268_s4 + $0xc4] ss:$16 sps:$4 sm:$0xff]   ;;  %v2540_v28 = vld [vmem:[%s3268_s4 + $0xc0] ss:$16 sps:$4 sm:$0xff]   ;;  %v2582_v61 = vld [vmem:[%s3268_s4 + $0xac] ss:$16 sps:$4 sm:$0xff]  }
  0xc8   : > { %v2538_v27 = vld [vmem:[%s3268_s4 + $0x2c4] ss:$16 sps:$4 sm:$0xff]   ;;  %v2541_v29 = vld [vmem:[%s3268_s4 + $0x2c0] ss:$16 sps:$4 sm:$0xff]   ;;  %v2580_v62 = vld [vmem:[%s3268_s4 + $0xa8] ss:$16 sps:$4 sm:$0xff]  }
  0xc9   : > { %962 = vmatpush1.bf16.msra.mxu0 %v2522_v16  ;;  %v2542_v30 = vld [vmem:[%s3268_s4 + $0xe4] ss:$16 sps:$4 sm:$0xff]   ;;  %v2546_v32 = vld [vmem:[%s3268_s4 + $0xe0] ss:$16 sps:$4 sm:$0xff]   ;;  %v2588_v1 = vld [vmem:[%s3268_s4 + $0xcc] ss:$16 sps:$4 sm:$0xff]  }
  0xca   : > { %1005 = vmatpush1.bf16.msra.mxu1 %v2523_v17  ;;  %963 = vmatprep.subr.bf16.mxu0 %v2524_v18  ;;  %v2544_v31 = vld [vmem:[%s3268_s4 + $0x2e4] ss:$16 sps:$4 sm:$0xff]   ;;  %v2547_v33 = vld [vmem:[%s3268_s4 + $0x2e0] ss:$16 sps:$4 sm:$0xff]   ;;  %v2586_v2 = vld [vmem:[%s3268_s4 + $0xc8] ss:$16 sps:$4 sm:$0xff]  }
  0xcb   : > { %1006 = vmatprep.subr.bf16.mxu1 %v2526_v19  ;;  %v350_v34 = vld [vmem:[#allocation3 + $0x10] sm:$0xff]  ;;  %v352_v52 = vld [vmem:[#allocation3 + $0x20] sm:$0xff]  ;;  %v2594_v6 = vld [vmem:[%s3268_s4 + $0xec] ss:$16 sps:$4 sm:$0xff]  }
  0xcc   : > { %v2548_v36 = vld [vmem:[%s3268_s4 + $0x104] ss:$16 sps:$4 sm:$0xff]   ;;  %v3324_v38 = vpack.c.bf16 %v353_v35, %v350_v34  ;;  %v2553_v40 = vld [vmem:[%s3268_s4 + $0x100] ss:$16 sps:$4 sm:$0xff]   ;;  %v355_v55 = vpack.c.bf16 %v352_v52, %v349_v51  ;;  %v2592_v7 = vld [vmem:[%s3268_s4 + $0xe8] ss:$16 sps:$4 sm:$0xff]  }
  0xcd   : > { %964 = vmatpush1.bf16.msra.mxu0 %v2528_v20  ;;  %v2554_v41 = vld [vmem:[%s3268_s4 + $0x124] ss:$16 sps:$4 sm:$0xff]   ;;  %v2559_v44 = vld [vmem:[%s3268_s4 + $0x120] ss:$16 sps:$4 sm:$0xff]   ;;  %v351_v10 = vld [vmem:[#allocation3 + $0x18] sm:$0xff] }
  0xce   : > { %1007 = vmatpush1.bf16.msra.mxu1 %v2529_v21  ;;  %965 = vmatprep.subr.bf16.mxu0 %v2530_v22  ;;  %v2560_v45 = vld [vmem:[%s3268_s4 + $0x144] ss:$16 sps:$4 sm:$0xff]   ;;  %v2565_v48 = vld [vmem:[%s3268_s4 + $0x140] ss:$16 sps:$4 sm:$0xff]   ;;  %v2598_v11 = vld [vmem:[%s3268_s4 + $0x10c] ss:$16 sps:$4 sm:$0xff]  }
  0xcf   : > { %1008 = vmatprep.subr.bf16.mxu1 %v2532_v23  ;;  %v2566_v49 = vld [vmem:[%s3268_s4 + $0x164] ss:$16 sps:$4 sm:$0xff]   ;;  %v2571_v54 = vld [vmem:[%s3268_s4 + $0x160] ss:$16 sps:$4 sm:$0xff]   ;;  %987 = vmatprep.mubr.bf16.mxu0 %v355_v55  ;;  %v2596_v13 = vld [vmem:[%s3268_s4 + $0x108] ss:$16 sps:$4 sm:$0xff]  }
  0xd0   : > { %v2572_v56 = vld [vmem:[%s3268_s4 + $0x184] ss:$16 sps:$4 sm:$0xff]   ;;  %v2577_v59 = vld [vmem:[%s3268_s4 + $0x180] ss:$16 sps:$4 sm:$0xff]   ;;  %v2601_v14 = vld [vmem:[%s3268_s4 + $0x12c] ss:$16 sps:$4 sm:$0xff]  }
  0xd1   : > { %966 = vmatpush1.bf16.msra.mxu0 %v2534_v24  ;;  %v2578_v60 = vld [vmem:[%s3268_s4 + $0x1a4] ss:$16 sps:$4 sm:$0xff]   ;;  %v2583_v63 = vld [vmem:[%s3268_s4 + $0x1a0] ss:$16 sps:$4 sm:$0xff]   ;;  %v2646_v16 = vld [vmem:[%s3277_s14 + $0x4] ss:$12 sps:$4 sm:$0xff]  }
  0xd2   : > { %1009 = vmatpush1.bf16.msra.mxu1 %v2535_v25  ;;  %967 = vmatprep.subr.bf16.mxu0 %v2536_v26  ;;  %v2584_v0 = vld [vmem:[%s3268_s4 + $0x1c4] ss:$16 sps:$4 sm:$0xff]   ;;  %v2589_v4 = vld [vmem:[%s3268_s4 + $0x1c0] ss:$16 sps:$4 sm:$0xff]   ;;  %v2599_v17 = vld [vmem:[%s3268_s4 + $0x128] ss:$16 sps:$4 sm:$0xff]  }
  0xd3   : > { %1010 = vmatprep.subr.bf16.mxu1 %v2538_v27  ;;  %v2590_v5 = vld [vmem:[%s3268_s4 + $0x1e4] ss:$16 sps:$4 sm:$0xff]   ;;  %v2595_v8 = vld [vmem:[%s3268_s4 + $0x1e0] ss:$16 sps:$4 sm:$0xff]   ;;  %v2604_v19 = vld [vmem:[%s3268_s4 + $0x14c] ss:$16 sps:$4 sm:$0xff]  }
  0xd4   : > { %v348_v9 = vld [vmem:[#allocation3] sm:$0xff]  ;;  %v2602_v20 = vld [vmem:[%s3268_s4 + $0x148] ss:$16 sps:$4 sm:$0xff]   ;;  %v2647_v21 = vld [vmem:[%s3277_s14 + $0x18] ss:$12 sps:$4 sm:$0xff]  }
  0xd5   : > { %968 = vmatpush1.bf16.msra.mxu0 %v2540_v28  ;;  %v354_v12 = vpack.c.bf16 %v351_v10, %v348_v9  ;;  %v2644_v15 = vld [vmem:[%s3277_s14] ss:$12 sps:$4 sm:$0xff]   ;;  %v2649_v18 = vld [vmem:[%s3277_s14 + $0x1c] ss:$12 sps:$4 sm:$0xff]   ;;  %v2607_v23 = vld [vmem:[%s3268_s4 + $0x16c] ss:$16 sps:$4 sm:$0xff]  }
  0xd6   : > { %1011 = vmatpush1.bf16.msra.mxu1 %v2541_v29  ;;  %969 = vmatprep.subr.bf16.mxu0 %v2542_v30  ;;  %v2652_v22 = vld [vmem:[%s3277_s14 + $0x34] ss:$12 sps:$4 sm:$0xff]   ;;  %v2650_v24 = vld [vmem:[%s3277_s14 + $0x30] ss:$12 sps:$4 sm:$0xff]   ;;  %v2655_v25 = vld [vmem:[%s3277_s14 + $0x4c] ss:$12 sps:$4 sm:$0xff]  }
  0xd7   : > { %1012 = vmatprep.subr.bf16.mxu1 %v2544_v31  ;;  %v2605_v26 = vld [vmem:[%s3268_s4 + $0x168] ss:$16 sps:$4 sm:$0xff]   ;;  %v2610_v27 = vld [vmem:[%s3268_s4 + $0x18c] ss:$16 sps:$4 sm:$0xff]  }
  0xd8   : > { %v2653_v28 = vld [vmem:[%s3277_s14 + $0x48] ss:$12 sps:$4 sm:$0xff]   ;;  %v2658_v29 = vld [vmem:[%s3277_s14 + $0x64] ss:$12 sps:$4 sm:$0xff]  }
  0xd9   : > { %970 = vmatpush1.bf16.msra.mxu0 %v2546_v32  ;;  %v2608_v30 = vld [vmem:[%s3268_s4 + $0x188] ss:$16 sps:$4 sm:$0xff]   ;;  %v2613_v31 = vld [vmem:[%s3268_s4 + $0x1ac] ss:$16 sps:$4 sm:$0xff]  }
  0xda   : > { %1013 = vmatpush1.bf16.msra.mxu1 %v2547_v33  ;;  %971 = vmatprep.subr.bf16.mxu0 %v2548_v36  ;;  %v2656_v32 = vld [vmem:[%s3277_s14 + $0x60] ss:$12 sps:$4 sm:$0xff]   ;;  %v2616_v34 = vld [vmem:[%s3268_s4 + $0x1cc] ss:$16 sps:$4 sm:$0xff]   ;;  %v2686_v9 = vld [vmem:[%s3277_s14 + $0x110] ss:$12 sps:$4 sm:$0xff]  }
  0xdb   : > { %1041 = vmatprep.subr.bf16.mxu1 %v2552_v37  ;;  %v2611_v33 = vld [vmem:[%s3268_s4 + $0x1a8] ss:$16 sps:$4 sm:$0xff]   ;;  %v2619_v36 = vld [vmem:[%s3268_s4 + $0x1ec] ss:$16 sps:$4 sm:$0xff]  }
  0xdc   : > { %v2614_v35 = vld [vmem:[%s3268_s4 + $0x1c8] ss:$16 sps:$4 sm:$0xff]   ;;  %v2640_v51 = vld [vmem:[%s3268_s4 + $0x2cc] ss:$16 sps:$4 sm:$0xff]  }
  0xdd   : > { %1031 = vmatmul.mubr.bf16.vlgmr.msra.gmra.mrb[0].mxu1 %v3324_v38  ;;  %972 = vmatpush1.bf16.msra.mxu0 %v2553_v40  ;;  %v2617_v37 = vld [vmem:[%s3268_s4 + $0x1e8] ss:$16 sps:$4 sm:$0xff]   ;;  %v2659_v52 = vld [vmem:[%s3277_s14 + $0x78] ss:$12 sps:$4 sm:$0xff]   ;;  %v2683_v10 = vld [vmem:[%s3277_s14 + $0x108] ss:$12 sps:$4 sm:$0xff]  }
  0xde   : > { %1042 = vmatpush1.bf16.msra.mxu1 %v2550_v39  ;;  %973 = vmatprep.subr.bf16.mxu0 %v2554_v41  ;;  %v2622_v39 = vld [vmem:[%s3268_s4 + $0x20c] ss:$16 sps:$4 sm:$0xff]   ;;  %v2620_v40 = vld [vmem:[%s3268_s4 + $0x208] ss:$16 sps:$4 sm:$0xff]  }
  0xdf   : > { %1043 = vmatprep.subr.bf16.mxu1 %v2558_v42  ;;  %1073 = vmatprep.mubr.bf16.mxu1 %v355_v55  ;;  %v2625_v41 = vld [vmem:[%s3268_s4 + $0x22c] ss:$16 sps:$4 sm:$0xff]   ;;  %v2623_v42 = vld [vmem:[%s3268_s4 + $0x228] ss:$16 sps:$4 sm:$0xff]  }
  0xe0   : > { %v2643_v55 = vld [vmem:[%s3268_s4 + $0x2ec] ss:$16 sps:$4 sm:$0xff]  }
  0xe1   : > { %974 = vmatpush1.bf16.msra.mxu0 %v2559_v44  ;;  %v2626_v44 = vld [vmem:[%s3268_s4 + $0x248] ss:$16 sps:$4 sm:$0xff]  }
  0xe2   : > { %1044 = vmatpush1.bf16.msra.mxu1 %v2556_v43  ;;  %975 = vmatprep.subr.bf16.mxu0 %v2560_v45  ;;  %v2628_v43 = vld [vmem:[%s3268_s4 + $0x24c] ss:$16 sps:$4 sm:$0xff]  }
  0xe3   : > { %1045 = vmatprep.subr.bf16.mxu1 %v2564_v46  ;;  %v2631_v45 = vld [vmem:[%s3268_s4 + $0x26c] ss:$16 sps:$4 sm:$0xff]   ;;  %v2629_v46 = vld [vmem:[%s3268_s4 + $0x268] ss:$16 sps:$4 sm:$0xff]  }
  0xe5   : > { %976 = vmatpush1.bf16.msra.mxu0 %v2565_v48  ;;  %v2632_v48 = vld [vmem:[%s3268_s4 + $0x288] ss:$16 sps:$4 sm:$0xff]  }
  0xe6   : > { %1046 = vmatpush1.bf16.msra.mxu1 %v2562_v47  ;;  %977 = vmatprep.subr.bf16.mxu0 %v2566_v49  ;;  %v2634_v47 = vld [vmem:[%s3268_s4 + $0x28c] ss:$16 sps:$4 sm:$0xff]   ;;  %v2635_v49 = vld [vmem:[%s3268_s4 + $0x2a8] ss:$16 sps:$4 sm:$0xff]  }
  0xe7   : > { %1047 = vmatprep.subr.bf16.mxu1 %v2570_v50  ;;  %v2661_v50 = vld [vmem:[%s3277_s14 + $0x7c] ss:$12 sps:$4 sm:$0xff]  }
  0xe9   : > { %978 = vmatpush1.bf16.msra.mxu0 %v2571_v54  ;;  %v2664_v54 = vld [vmem:[%s3277_s14 + $0x94] ss:$12 sps:$4 sm:$0xff]  }
  0xea   : > { %1048 = vmatpush1.bf16.msra.mxu1 %v2568_v53  ;;  %979 = vmatprep.subr.bf16.mxu0 %v2572_v56  ;;  %v2638_v53 = vld [vmem:[%s3268_s4 + $0x2c8] ss:$16 sps:$4 sm:$0xff]  }
  0xeb   : > { %1049 = vmatprep.subr.bf16.mxu1 %v2576_v57  ;;  %v2662_v56 = vld [vmem:[%s3277_s14 + $0x90] ss:$12 sps:$4 sm:$0xff]   ;;  %v2667_v57 = vld [vmem:[%s3277_s14 + $0xac] ss:$12 sps:$4 sm:$0xff]  }
  0xed   : > { %980 = vmatpush1.bf16.msra.mxu0 %v2577_v59  ;;  %v2641_v59 = vld [vmem:[%s3268_s4 + $0x2e8] ss:$16 sps:$4 sm:$0xff]  }
  0xee   : > { %1050 = vmatpush1.bf16.msra.mxu1 %v2574_v58  ;;  %981 = vmatprep.subr.bf16.mxu0 %v2578_v60  ;;  %v2665_v58 = vld [vmem:[%s3277_s14 + $0xa8] ss:$12 sps:$4 sm:$0xff]   ;;  %v2670_v60 = vld [vmem:[%s3277_s14 + $0xc4] ss:$12 sps:$4 sm:$0xff]  }
  0xef   : > { %1051 = vmatprep.subr.bf16.mxu1 %v2582_v61  ;;  %v2671_v61 = vld [vmem:[%s3277_s14 + $0xc8] ss:$12 sps:$4 sm:$0xff]  }
  0xf1   : > { %982 = vmatpush1.bf16.msra.mxu0 %v2583_v63  ;;  %v2672_v63 = vld [vmem:[%s3277_s14 + $0x8] ss:$12 sps:$4 sm:$0xff]  }
  0xf2   : > { %1052 = vmatpush1.bf16.msra.mxu1 %v2580_v62  ;;  %983 = vmatprep.subr.bf16.mxu0 %v2584_v0  ;;  %v2668_v62 = vld [vmem:[%s3277_s14 + $0xc0] ss:$12 sps:$4 sm:$0xff]   ;;  %v2675_v0 = vld [vmem:[%s3277_s14 + $0xdc] ss:$12 sps:$4 sm:$0xff]  }
  0xf3   : > { %1053 = vmatprep.subr.bf16.mxu1 %v2588_v1  ;;  %v2676_v1 = vld [vmem:[%s3277_s14 + $0xe0] ss:$12 sps:$4 sm:$0xff]  }
  0xf5   : > { %984 = vmatpush1.bf16.msra.mxu0 %v2589_v4  ;;  %v2677_v4 = vld [vmem:[%s3277_s14 + $0x20] ss:$12 sps:$4 sm:$0xff]  }
  0xf6   : > { %1054 = vmatpush1.bf16.msra.mxu1 %v2586_v2  ;;  %985 = vmatprep.subr.bf16.mxu0 %v2590_v5  ;;  %v2673_v2 = vld [vmem:[%s3277_s14 + $0xd8] ss:$12 sps:$4 sm:$0xff]   ;;  %v2680_v5 = vld [vmem:[%s3277_s14 + $0xf4] ss:$12 sps:$4 sm:$0xff]  }
  0xf7   : > { %1055 = vmatprep.subr.bf16.mxu1 %v2594_v6  ;;  %v2681_v6 = vld [vmem:[%s3277_s14 + $0xf8] ss:$12 sps:$4 sm:$0xff]  }
  0xf9   : > { %986 = vmatpush1.bf16.msra.mxu0 %v2595_v8  ;;  %v2682_v8 = vld [vmem:[%s3277_s14 + $0x38] ss:$12 sps:$4 sm:$0xff]  }
  0xfa   : > { %1056 = vmatpush1.bf16.msra.mxu1 %v2592_v7  ;;  %1785 = vmatprep.subr.bf16.mxu0 %v2646_v16  ;;  %v2678_v7 = vld [vmem:[%s3277_s14 + $0xf0] ss:$12 sps:$4 sm:$0xff]  }
  0xfb   : > { %1057 = vmatprep.subr.bf16.mxu1 %v2598_v11  ;;  %v2687_v11 = vld [vmem:[%s3277_s14 + $0x50] ss:$12 sps:$4 sm:$0xff]  }
  0xfc   : > { %988 = vmatmul.mubr.bf16.vlgmr.msra.gmra.mrb[0].mxu0 %v354_v12  ;;  %v2695_v16 = vld [vmem:[%s3277_s14 + $0x13c] ss:$12 sps:$4 sm:$0xff]  }
  0xfd   : > { %1786 = vmatpush1.bf16.msra.mxu0 %v2644_v15  ;;  %v2692_v15 = vld [vmem:[%s3277_s14 + $0x68] ss:$12 sps:$4 sm:$0xff]  }
  0xfe   : > { %1058 = vmatpush1.bf16.msra.mxu1 %v2596_v13  ;;  %1787 = vmatprep.subr.bf16.mxu0 %v2649_v18  ;;  %v2691_v13 = vld [vmem:[%s3277_s14 + $0x128] ss:$12 sps:$4 sm:$0xff]   ;;  %v2696_v18 = vld [vmem:[%s3277_s14 + $0x140] ss:$12 sps:$4 sm:$0xff]  }
  0xff   : > { %1059 = vmatprep.subr.bf16.mxu1 %v2601_v14  ;;  %v2688_v14 = vld [vmem:[%s3277_s14 + $0x120] ss:$12 sps:$4 sm:$0xff]  }
 0x101   : > { %1788 = vmatpush1.bf16.msra.mxu0 %v2647_v21  ;;  %v2698_v21 = vld [vmem:[%s3277_s14 + $0x150] ss:$12 sps:$4 sm:$0xff]  }
 0x102   : > { %1060 = vmatpush1.bf16.msra.mxu1 %v2599_v17  ;;  %1789 = vmatprep.subr.bf16.mxu0 %v2652_v22  ;;  %v2693_v17 = vld [vmem:[%s3277_s14 + $0x138] ss:$12 sps:$4 sm:$0xff]  }
 0x103   : > { %1061 = vmatprep.subr.bf16.mxu1 %v2604_v19  ;;  %v2697_v19 = vld [vmem:[%s3277_s14 + $0x80] ss:$12 sps:$4 sm:$0xff]   ;;  %v2701_v22 = vld [vmem:[%s3277_s14 + $0x158] ss:$12 sps:$4 sm:$0xff]  }
 0x105   : > { %1790 = vmatpush1.bf16.msra.mxu0 %v2650_v24  ;;  %v2705_v24 = vld [vmem:[%s3277_s14 + $0x16c] ss:$12 sps:$4 sm:$0xff]  }
 0x106   : > { %1062 = vmatpush1.bf16.msra.mxu1 %v2602_v20  ;;  %1791 = vmatprep.subr.bf16.mxu0 %v2655_v25  ;;  %v2700_v20 = vld [vmem:[%s3277_s14 + $0x154] ss:$12 sps:$4 sm:$0xff]  }
 0x107   : > { %1063 = vmatprep.subr.bf16.mxu1 %v2607_v23  ;;  %v2702_v23 = vld [vmem:[%s3277_s14 + $0x98] ss:$12 sps:$4 sm:$0xff]   ;;  %v2703_v25 = vld [vmem:[%s3277_s14 + $0x168] ss:$12 sps:$4 sm:$0xff]  }
 0x109   : > { %1792 = vmatpush1.bf16.msra.mxu0 %v2653_v28  ;;  %v2710_v28 = vld [vmem:[%s3277_s14 + $0x184] ss:$12 sps:$4 sm:$0xff]  }
 0x10a   : > { %1064 = vmatpush1.bf16.msra.mxu1 %v2605_v26  ;;  %1793 = vmatprep.subr.bf16.mxu0 %v2658_v29  ;;  %v2706_v26 = vld [vmem:[%s3277_s14 + $0x170] ss:$12 sps:$4 sm:$0xff]   ;;  %v2732_v29 = vld [vmem:[%s3277_s14 + $0x248] ss:$12 sps:$4 sm:$0xff]  }
 0x10b   : > { %1065 = vmatprep.subr.bf16.mxu1 %v2610_v27  ;;  %v2707_v27 = vld [vmem:[%s3277_s14 + $0xb0] ss:$12 sps:$4 sm:$0xff]  }
 0x10d   : > { %1794 = vmatpush1.bf16.msra.mxu0 %v2656_v32 }
 0x10e   : > { %1066 = vmatpush1.bf16.msra.mxu1 %v2608_v30  ;;  %1795 = vmatprep.subr.bf16.mxu0 %v2661_v50 }
 0x10f   : > { %1067 = vmatprep.subr.bf16.mxu1 %v2613_v31 }
 0x111   : > { %1796 = vmatpush1.bf16.msra.mxu0 %v2659_v52 }
 0x112   : > { %1068 = vmatpush1.bf16.msra.mxu1 %v2611_v33  ;;  %1797 = vmatprep.subr.bf16.mxu0 %v2664_v54 }
 0x113   : > { %1069 = vmatprep.subr.bf16.mxu1 %v2616_v34  ;;  %v455_v34 = vlaneseq }
 0x115   : > { %1798 = vmatpush1.bf16.msra.mxu0 %v2662_v56 }
 0x116   : > { %1070 = vmatpush1.bf16.msra.mxu1 %v2614_v35  ;;  %1799 = vmatprep.subr.bf16.mxu0 %v2667_v57  ;;  %v3441_v35 = vshrl.u32 %v455_v34, 7 }
 0x117   : > { %1071 = vmatprep.subr.bf16.mxu1 %v2619_v36 }
 0x118   : > { %v457_v36 = vsub.s32 0, %v3441_v35  ;;  %v465_v34 = vsub.s32 2, %v3441_v35 }
 0x119   : > { %1800 = vmatpush1.bf16.msra.mxu0 %v2665_v58 }
 0x11a   : > { %1072 = vmatpush1.bf16.msra.mxu1 %v2617_v37  ;;  %1801 = vmatprep.subr.bf16.mxu0 %v2670_v60  ;;  %v3446_v37 = vld [vmem:[%s289_s9] sm:$0xf]  ;;  %v2736_v60 = vld [vmem:[%s3277_s14 + $0x188] ss:$12 sps:$4 sm:$0xff]  }
 0x11b   : > { %1084 = vmatprep.subr.bf16.mxu1 %v2622_v39  ;;  %v461_v39 = vsub.s32 1, %v3441_v35 }
 0x11d   : > { %1074 = vmatmul.mubr.bf16.vlgmr.msra.gmra.mrb[4].mxu1 %v354_v12  ;;  %1802 = vmatpush1.bf16.msra.mxu0 %v2668_v62  ;;  %v2690_v12 = vld [vmem:[%s3277_s14 + $0x124] ss:$12 sps:$4 sm:$0xff]   ;;  %v2737_v62 = vld [vmem:[%s3277_s14 + $0x260] ss:$12 sps:$4 sm:$0xff]  }
 0x11e   : > { %1085 = vmatpush1.bf16.msra.mxu1 %v2620_v40  ;;  %1116 = vmatprep.mubr.bf16.mxu1 %v3009_v3  ;;  %v2637_v3 = vld [vmem:[%s3268_s4 + $0x2ac] ss:$16 sps:$4 sm:$0xff]   ;;  %v458_v40 = vrot.slane %v3446_v37, %v457_v36 }
 0x11f   : > { %1086 = vmatprep.subr.bf16.mxu1 %v2625_v41  ;;  %1803 = vmatprep.subr.bf16.mxu0 %v2675_v0  ;;  %v462_v41 = vrot.slane %v3446_v37, %v461_v39  ;;  %v2741_v0 = vld [vmem:[%s3277_s14 + $0x1a0] ss:$12 sps:$4 sm:$0xff]  }
 0x121   : > { %1804 = vmatpush1.bf16.msra.mxu0 %v2673_v2  ;;  %v2742_v2 = vld [vmem:[%s3277_s14 + $0x278] ss:$12 sps:$4 sm:$0xff]  }
 0x122   : > { %1087 = vmatpush1.bf16.msra.mxu1 %v2623_v42  ;;  %1805 = vmatprep.subr.bf16.mxu0 %v2680_v5  ;;  %v2746_v5 = vld [vmem:[%s3277_s14 + $0x1b8] ss:$12 sps:$4 sm:$0xff]  }
 0x123   : > { %1088 = vmatprep.subr.bf16.mxu1 %v2628_v43 }
 0x125   : > { %1806 = vmatpush1.bf16.msra.mxu0 %v2678_v7  ;;  %v2747_v7 = vld [vmem:[%s3277_s14 + $0x290] ss:$12 sps:$4 sm:$0xff]  }
 0x126   : > { %1089 = vmatpush1.bf16.msra.mxu1 %v2626_v44 }
 0x127   : > { %1090 = vmatprep.subr.bf16.mxu1 %v2631_v45 }
 0x12a   : > { %1091 = vmatpush1.bf16.msra.mxu1 %v2629_v46 }
 0x12b   : > { %1092 = vmatprep.subr.bf16.mxu1 %v2634_v47 }
 0x12e   : > { %1093 = vmatpush1.bf16.msra.mxu1 %v2632_v48 }
 0x12f   : > { %1094 = vmatprep.subr.bf16.mxu1 %v2637_v3 }
 0x132   : > { %1095 = vmatpush1.bf16.msra.mxu1 %v2635_v49 }
 0x133   : > { %1096 = vmatprep.subr.bf16.mxu1 %v2640_v51 }
 0x136   : > { %1097 = vmatpush1.bf16.msra.mxu1 %v2638_v53 }
 0x137   : > { %1098 = vmatprep.subr.bf16.mxu1 %v2643_v55 }
 0x13a   : > { %1099 = vmatpush1.bf16.msra.mxu1 %v2641_v59  ;;  %v2708_v59 = vld [vmem:[%s3277_s14 + $0x180] ss:$12 sps:$4 sm:$0xff]  }
 0x13b   : > { %2344 = vmatprep.subr.bf16.mxu1 %v2671_v61  ;;  %v2713_v61 = vld [vmem:[%s3277_s14 + $0x19c] ss:$12 sps:$4 sm:$0xff]  }
 0x13d   : > { %1117 = vmatmul.mubr.bf16.vlgmr.msra.gmra.mrb[4].mxu1 %v3324_v38  ;;  %v2685_v38 = vld [vmem:[%s3277_s14 + $0x10c] ss:$12 sps:$4 sm:$0xff]  }
 0x13e   : > { %2345 = vmatpush3.bf16.msra.mxu1 %v2672_v63  ;;  %1807 = vmatprep.subr.bf16.mxu0 %v2685_v38  ;;  %v2711_v63 = vld [vmem:[%s3277_s14 + $0x198] ss:$12 sps:$4 sm:$0xff]   ;;  %v2751_v38 = vld [vmem:[%s3277_s14 + $0x1d0] ss:$12 sps:$4 sm:$0xff]  }
 0x13f   : > { %2346 = vmatprep.subr.bf16.mxu1 %v2676_v1  ;;  %1808 = vmatpush1.bf16.msra.mxu0 %v2683_v10  ;;  %v2716_v1 = vld [vmem:[%s3277_s14 + $0x1b4] ss:$12 sps:$4 sm:$0xff]  }
 0x140   : > { %1809 = vmatprep.subr.bf16.mxu0 %v2690_v12  ;;  %v2752_v10 = vld [vmem:[%s3277_s14 + $0x2a8] ss:$12 sps:$4 sm:$0xff]  }
 0x141   : > { %v2756_v12 = vld [vmem:[%s3277_s14 + $0x1e8] ss:$12 sps:$4 sm:$0xff]  }
 0x142   : > { %2347 = vmatpush3.bf16.msra.mxu1 %v2677_v4  ;;  %v2714_v4 = vld [vmem:[%s3277_s14 + $0x1b0] ss:$12 sps:$4 sm:$0xff]  }
 0x143   : > { %2348 = vmatprep.subr.bf16.mxu1 %v2681_v6  ;;  %1810 = vmatpush1.bf16.msra.mxu0 %v2688_v14  ;;  %v2719_v6 = vld [vmem:[%s3277_s14 + $0x1cc] ss:$12 sps:$4 sm:$0xff]  }
 0x144   : > { %1811 = vmatprep.subr.bf16.mxu0 %v2695_v16  ;;  %v2757_v14 = vld [vmem:[%s3277_s14 + $0x2c0] ss:$12 sps:$4 sm:$0xff]  }
 0x145   : > { %v2761_v16 = vld [vmem:[%s3277_s14 + $0x200] ss:$12 sps:$4 sm:$0xff]  }
 0x146   : > { %2349 = vmatpush3.bf16.msra.mxu1 %v2682_v8  ;;  %v2717_v8 = vld [vmem:[%s3277_s14 + $0x1c8] ss:$12 sps:$4 sm:$0xff]  }
 0x147   : > { %2350 = vmatprep.subr.bf16.mxu1 %v2686_v9  ;;  %1812 = vmatpush1.bf16.msra.mxu0 %v2693_v17  ;;  %v2722_v9 = vld [vmem:[%s3277_s14 + $0x1e4] ss:$12 sps:$4 sm:$0xff]   ;;  %v2728_v17 = vld [vmem:[%s3277_s14 + $0x214] ss:$12 sps:$4 sm:$0xff]  }
 0x148   : > { %1813 = vmatprep.subr.bf16.mxu0 %v2700_v20  ;;  %v2766_v20 = vld [vmem:[%s3277_s14 + $0x218] ss:$12 sps:$4 sm:$0xff]  }
 0x14a   : > { %2351 = vmatpush3.bf16.msra.mxu1 %v2687_v11  ;;  %v2720_v11 = vld [vmem:[%s3277_s14 + $0x1e0] ss:$12 sps:$4 sm:$0xff]  }
 0x14b   : > { %2352 = vmatprep.subr.bf16.mxu1 %v2691_v13  ;;  %1814 = vmatpush1.bf16.msra.mxu0 %v2698_v21  ;;  %v2725_v13 = vld [vmem:[%s3277_s14 + $0x1fc] ss:$12 sps:$4 sm:$0xff]   ;;  %v2731_v21 = vld [vmem:[%s3277_s14 + $0x22c] ss:$12 sps:$4 sm:$0xff]  }
 0x14c   : > { %1815 = vmatprep.subr.bf16.mxu0 %v2705_v24  ;;  %v2771_v24 = vld [vmem:[%s3277_s14 + $0x230] ss:$12 sps:$4 sm:$0xff]  }
 0x14e   : > { %2353 = vmatpush3.bf16.msra.mxu1 %v2692_v15  ;;  %v2723_v15 = vld [vmem:[%s3277_s14 + $0x1f8] ss:$12 sps:$4 sm:$0xff]  }
 0x14f   : > { %2354 = vmatprep.subr.bf16.mxu1 %v2696_v18  ;;  %1816 = vmatpush1.bf16.msra.mxu0 %v2703_v25  ;;  %v2762_v18 = vld [vmem:[%s3277_s14 + $0x2d8] ss:$12 sps:$4 sm:$0xff]  }
 0x150   : > { %1828 = vmatprep.subr.bf16.mxu0 %v2710_v28  ;;  %v2735_v25 = vld [vmem:[%s3277_s14 + $0x244] ss:$12 sps:$4 sm:$0xff]  }
 0x151   : > { %v2738_v28 = vld [vmem:[%s3277_s14 + $0x258] ss:$12 sps:$4 sm:$0xff]  }
 0x152   : > { %2355 = vmatpush3.bf16.msra.mxu1 %v2697_v19  ;;  %v2726_v19 = vld [vmem:[%s3277_s14 + $0x210] ss:$12 sps:$4 sm:$0xff]  }
 0x153   : > { %2356 = vmatprep.subr.bf16.mxu1 %v2701_v22  ;;  %v2767_v22 = vld [vmem:[%s3277_s14 + $0x2f0] ss:$12 sps:$4 sm:$0xff]  }
 0x156   : > { %2357 = vmatpush3.bf16.msra.mxu1 %v2702_v23  ;;  %v2729_v23 = vld [vmem:[%s3277_s14 + $0x228] ss:$12 sps:$4 sm:$0xff]  }
 0x157   : > { %2358 = vmatprep.subr.bf16.mxu1 %v2706_v26  ;;  %v2733_v26 = vld [vmem:[%s3277_s14 + $0x240] ss:$12 sps:$4 sm:$0xff]  }
 0x15a   : > { %2359 = vmatpush3.bf16.msra.mxu1 %v2707_v27  ;;  %v2740_v27 = vld [vmem:[%s3277_s14 + $0x25c] ss:$12 sps:$4 sm:$0xff]  }
 0x15b   : > { %2366 = vmatprep.subr.bf16.mxu1 %v2732_v29  ;;  %v2745_v29 = vld [vmem:[%s3277_s14 + $0x274] ss:$12 sps:$4 sm:$0xff]  }
 0x1b0   : > { %v1032_v30 = vpop.f32.mrb[0].mxu1 }
 0x1b1   : > { %v1034_v31 = vpop.f32.mrb[1].mxu1 }
 0x1b2   : > { %v1036_v32 = vpop.f32.mrb[2].mxu1 }
 0x1b3   : > { %v1038_v33 = vpop.f32.mrb[3].mxu1 }
 0x1cf   : > { %v989_v42 = vpop.f32.mrb[0].mxu0 }
 0x1d0   : > { %v990_v43 = vadd.f32 %v989_v42, %v458_v40  ;;  %v991_v44 = vpop.f32.mrb[1].mxu0  ;;  %v2760_v42 = vld [vmem:[%s3277_s14 + $0x2bc] ss:$12 sps:$4 sm:$0xff]  }
 0x1d1   : > { %v992_v45 = vadd.f32 %v991_v44, %v462_v41  ;;  %v993_v46 = vpop.f32.mrb[2].mxu0  ;;  %v2758_v44 = vld [vmem:[%s3277_s14 + $0x2b8] ss:$12 sps:$4 sm:$0xff]  }
 0x1d2   : > { %v1033_v47 = vadd.f32 %v1032_v30, %v990_v43  ;;  %v994_v48 = vadd.f32 %v993_v46, %v458_v40  ;;  %v995_v3 = vpop.f32.mrb[3].mxu0  ;;  %v2743_v30 = vld [vmem:[%s3277_s14 + $0x270] ss:$12 sps:$4 sm:$0xff]   ;;  %v2753_v40 = vld [vmem:[%s3277_s14 + $0x2a0] ss:$12 sps:$4 sm:$0xff]   ;;  %v466_v43 = vrot.slane %v3446_v37, %v465_v34 }
 0x1d3   : > { %v1035_v49 = vadd.f32 %v1034_v31, %v992_v45  ;;  %v996_v50 = vadd.f32 %v995_v3, %v462_v41  ;;  %v2750_v31 = vld [vmem:[%s3277_s14 + $0x28c] ss:$12 sps:$4 sm:$0xff]   ;;  %v469_v41 = vsub.s32 3, %v3441_v35  ;;  %v2765_v46 = vld [vmem:[%s3277_s14 + $0x2d4] ss:$12 sps:$4 sm:$0xff]  }
 0x1d4   : > { %v1037_v51 = vadd.f32 %v1036_v32, %v994_v48  ;;  %v1127_v53 = vmax.f32 %v1033_v47, 0.0  ;;  %v2748_v32 = vld [vmem:[%s3277_s14 + $0x288] ss:$12 sps:$4 sm:$0xff]  }
 0x1d5   : > { %v1039_v52 = vadd.f32 %v1038_v33, %v996_v50  ;;  %v1128_v55 = vmax.f32 %v1035_v49, 0.0  ;;  %v2755_v33 = vld [vmem:[%s3277_s14 + $0x2a4] ss:$12 sps:$4 sm:$0xff]   ;;  %v470_v45 = vrot.slane %v3446_v37, %v469_v41  ;;  %v2768_v37 = vld [vmem:[%s3277_s14 + $0x2e8] ss:$12 sps:$4 sm:$0xff]  }
 0x1d6   : > { %v1131_v54 = vmax.f32 %v1037_v51, 0.0  ;;  %v2763_v51 = vld [vmem:[%s3277_s14 + $0x2d0] ss:$12 sps:$4 sm:$0xff]  }
 0x1d7   : > { %v1132_v56 = vmax.f32 %v1039_v52, 0.0 }
 0x1d8   : > { %v1141_v57 = vpack.c.bf16 %v1131_v54, %v1127_v53  ;;  %v2770_v54 = vld [vmem:[%s3277_s14 + $0x2ec] ss:$12 sps:$4 sm:$0xff]  }
 0x1d9   : > { %v1142_v58 = vpack.c.bf16 %v1132_v56, %v1128_v55 }
 0x1db   : > { %1817 = vmatprep.mubr.bf16.mxu0 %v1142_v58  ;;  %1903 = vmatprep.mubr.bf16.mxu1 %v1142_v58 }
 0x1dc   : > { %1818 = vmatmul.mubr.bf16.vlgmr.msra.gmra.mrb[4].mxu0 %v1141_v57  ;;  %1904 = vmatmul.mubr.bf16.vlgmr.msra.gmra.mrb[8].mxu1 %v1141_v57 }
 0x1dd   : > { %1829 = vmatpush1.bf16.msra.mxu0 %v2708_v59  ;;  %2367 = vmatpush3.bf16.msra.mxu1 %v2736_v60 }
 0x1de   : > { %1830 = vmatprep.subr.bf16.mxu0 %v2713_v61  ;;  %2368 = vmatprep.subr.bf16.mxu1 %v2737_v62 }
 0x1e1   : > { %1831 = vmatpush1.bf16.msra.mxu0 %v2711_v63  ;;  %2369 = vmatpush3.bf16.msra.mxu1 %v2741_v0 }
 0x1e2   : > { %1832 = vmatprep.subr.bf16.mxu0 %v2716_v1  ;;  %2370 = vmatprep.subr.bf16.mxu1 %v2742_v2 }
 0x1e5   : > { %1833 = vmatpush1.bf16.msra.mxu0 %v2714_v4  ;;  %2371 = vmatpush3.bf16.msra.mxu1 %v2746_v5  ;;  %v1135_v5 = vld [vmem:[#allocation2] sm:$0xff] }
 0x1e6   : > { %1834 = vmatprep.subr.bf16.mxu0 %v2719_v6  ;;  %2372 = vmatprep.subr.bf16.mxu1 %v2747_v7  ;;  %v1136_v7 = vld [vmem:[#allocation2 + $0x8] sm:$0xff] }
 0x1e9   : > { %1835 = vmatpush1.bf16.msra.mxu0 %v2717_v8  ;;  %2373 = vmatpush3.bf16.msra.mxu1 %v2751_v38 }
 0x1ea   : > { %1836 = vmatprep.subr.bf16.mxu0 %v2722_v9  ;;  %2374 = vmatprep.subr.bf16.mxu1 %v2752_v10  ;;  %v1138_v9 = vld [vmem:[#allocation2 + $0x18] sm:$0xff] }
 0x1ed   : > { %1837 = vmatpush1.bf16.msra.mxu0 %v2720_v11  ;;  %2375 = vmatpush3.bf16.msra.mxu1 %v2756_v12 }
 0x1ee   : > { %1838 = vmatprep.subr.bf16.mxu0 %v2725_v13  ;;  %2376 = vmatprep.subr.bf16.mxu1 %v2757_v14  ;;  %v1139_v14 = vld [vmem:[#allocation2 + $0x20] sm:$0xff] }
 0x1f1   : > { %1839 = vmatpush1.bf16.msra.mxu0 %v2723_v15  ;;  %2377 = vmatpush3.bf16.msra.mxu1 %v2761_v16  ;;  %v1137_v15 = vld [vmem:[#allocation2 + $0x10] sm:$0xff] }
 0x1f2   : > { %1840 = vmatprep.subr.bf16.mxu0 %v2728_v17  ;;  %2378 = vmatprep.subr.bf16.mxu1 %v2762_v18 }
 0x1f5   : > { %1841 = vmatpush1.bf16.msra.mxu0 %v2726_v19  ;;  %2379 = vmatpush3.bf16.msra.mxu1 %v2766_v20 }
 0x1f6   : > { %1842 = vmatprep.subr.bf16.mxu0 %v2731_v21  ;;  %2380 = vmatprep.subr.bf16.mxu1 %v2767_v22 }
 0x1f9   : > { %1843 = vmatpush1.bf16.msra.mxu0 %v2729_v23  ;;  %2381 = vmatpush3.bf16.msra.mxu1 %v2771_v24  ;;  %v1140_v23 = vld [vmem:[#allocation2 + $0x28] sm:$0xff] }
 0x1fa   : > { %1844 = vmatprep.subr.bf16.mxu0 %v2735_v25 }
 0x1fd   : > { %1845 = vmatpush1.bf16.msra.mxu0 %v2733_v26 }
 0x1fe   : > { %1846 = vmatprep.subr.bf16.mxu0 %v2740_v27 }
 0x201   : > { %1847 = vmatpush1.bf16.msra.mxu0 %v2738_v28 }
 0x202   : > { %1848 = vmatprep.subr.bf16.mxu0 %v2745_v29  ;;  %v1975_v29 = vld [vmem:[#allocation11] sm:$0x7] (!%p2337_p8) }
 0x205   : > { %1849 = vmatpush1.bf16.msra.mxu0 %v2743_v30 }
 0x206   : > { %1850 = vmatprep.subr.bf16.mxu0 %v2750_v31  ;;  %v1980_v31 = vrot.slane (!%p2337_p8), %v1975_v29, %v457_v36 }
 0x209   : > { %1851 = vmatpush1.bf16.msra.mxu0 %v2748_v32  ;;  %v1984_v32 = vrot.slane (!%p2337_p8), %v1975_v29, %v461_v39 }
 0x20a   : > { %1852 = vmatprep.subr.bf16.mxu0 %v2755_v33 }
 0x20d   : > { %1853 = vmatpush1.bf16.msra.mxu0 %v2753_v40  ;;  %v1988_v40 = vrot.slane (!%p2337_p8), %v1975_v29, %v465_v34 }
 0x20e   : > { %1854 = vmatprep.subr.bf16.mxu0 %v2760_v42 }
 0x210   : > { %v1118_v47 = vpop.f32.mrb[4].mxu1 }
 0x211   : > { %v2396_v48 = vadd.f32 %v1118_v47, %v466_v43  ;;  %v1120_v3 = vpop.f32.mrb[5].mxu1  ;;  %1855 = vmatpush1.bf16.msra.mxu0 %v2758_v44 }
 0x212   : > { %v2397_v49 = vadd.f32 %v1120_v3, %v470_v45  ;;  %v1122_v50 = vpop.f32.mrb[6].mxu1  ;;  %1856 = vmatprep.subr.bf16.mxu0 %v2765_v46 }
 0x213   : > { %v2398_v52 = vadd.f32 %v1122_v50, %v466_v43  ;;  %v1124_v53 = vpop.f32.mrb[7].mxu1  ;;  %v1129_v56 = vmax.f32 %v2396_v48, 0.0 }
 0x214   : > { %v2399_v55 = vadd.f32 %v1124_v53, %v470_v45  ;;  %v1130_v58 = vmax.f32 %v2397_v49, 0.0 }
 0x215   : > { %v1133_v57 = vmax.f32 %v2398_v52, 0.0  ;;  %1857 = vmatpush1.bf16.msra.mxu0 %v2763_v51 }
 0x216   : > { %v1134_v59 = vmax.f32 %v2399_v55, 0.0  ;;  %1858 = vmatprep.subr.bf16.mxu0 %v2770_v54 }
 0x217   : > { %v1143_v60 = vpack.c.bf16 %v1133_v57, %v1129_v56 }
 0x218   : > { %v1144_v61 = vpack.c.bf16 %v1134_v59, %v1130_v58 }
 0x219   : > { %1859 = vmatpush1.bf16.msra.mxu0 %v2768_v37 }
 0x21a   : > { %1860 = vmatprep.mubr.bf16.mxu0 %v1144_v61  ;;  %1944 = vmatprep.mubr.bf16.mxu1 %v1144_v61 }
 0x21b   : > { %1945 = vmatmul.mubr.bf16.vlgmr.msra.gmra.mrb[12].mxu1 %v1143_v60 }
 0x21c   : > { %1861 = vmatmul.mubr.bf16.vlgmr.msra.gmra.mrb[4].mxu0 %v1143_v60 }
 0x2af   : > { %v2360_v62 = vpop.f32.mrb[8].mxu1 }
 0x2b0   : > { %v2361_v63 = vpop.f32.mrb[9].mxu1 }
 0x2b1   : > { %v2362_v0 = vadd.f32 %v2361_v63, %v2360_v62  ;;  %v2363_v1 = vpop.f32.mrb[10].mxu1 }
 0x2b2   : > { %v2364_v2 = vpop.f32.mrb[11].mxu1 }
 0x2b3   : > { %v2365_v4 = vadd.f32 %v2364_v2, %v2363_v1 }
 0x2ee   : > { %v2382_v6 = vpop.f32.mrb[12].mxu1 }
 0x2ef   : > { %v1862_v8 = vpop.f32.mrb[4].mxu0  ;;  %v2383_v38 = vpop.f32.mrb[13].mxu1 }
 0x2f0   : > { %v1953_v10 = vadd.f32 %v1862_v8, %v1135_v5  ;;  %v2384_v11 = vadd.f32 %v2383_v38, %v2382_v6  ;;  %v1864_v12 = vpop.f32.mrb[5].mxu0  ;;  %v2385_v13 = vpop.f32.mrb[14].mxu1 }
 0x2f1   : > { %v1954_v16 = vadd.f32 %v1864_v12, %v1136_v7  ;;  %v1866_v17 = vpop.f32.mrb[6].mxu0  ;;  %v2386_v18 = vpop.f32.mrb[15].mxu1 }
 0x2f2   : > { %1959 = vst [vmem:[#allocation2] sm:$0xff] %v1953_v10  ;;  %v1947_v19 = vadd.f32 %v2384_v11, %v2362_v0  ;;  %v1956_v20 = vadd.f32 %v1866_v17, %v1138_v9  ;;  %v2387_v21 = vadd.f32 %v2386_v18, %v2385_v13  ;;  %v1868_v22 = vpop.f32.mrb[7].mxu0  ;;  %1968 = sbr.rel (%p2337_p8) target bundleno = 771 (0x303), region = 68 }
 0x2f3   : > { %1960 = vst [vmem:[#allocation2 + $0x8] sm:$0xff] %v1954_v16  ;;  %v1957_v24 = vadd.f32 %v1868_v22, %v1139_v14 }
 0x2f4   : > { %v1955_v25 = vadd.f32 %v1947_v19, %v1137_v15  ;;  %1962 = vst [vmem:[#allocation2 + $0x18] sm:$0xff] %v1956_v20  ;;  %v1950_v26 = vadd.f32 %v2387_v21, %v2365_v4 }
 0x2f5   : > { %1963 = vst [vmem:[#allocation2 + $0x20] sm:$0xff] %v1957_v24 }
 0x2f6   : > { %1961 = vst [vmem:[#allocation2 + $0x10] sm:$0xff] %v1955_v25  ;;  %v1958_v27 = vadd.f32 %v1950_v26, %v1140_v23 }
 0x2f8   : > { %1964 = vst [vmem:[#allocation2 + $0x28] sm:$0xff] %v1958_v27 }
 0x2f9   : > { %v1969_v28 = vld [vmem:[#allocation2] sm:$0xff] }
 0x2fa   : > { %v1970_v30 = vld [vmem:[#allocation2 + $0x8] sm:$0xff]  ;;  %v1992_v44 = vadd.f32 %v1980_v31, %v1969_v28 }
 0x2fb   : > { %v1972_v41 = vld [vmem:[#allocation2 + $0x18] sm:$0xff]  ;;  %v1993_v45 = vadd.f32 %v1984_v32, %v1970_v30 }
 0x2fc   : > { %v1973_v42 = vld [vmem:[#allocation2 + $0x20] sm:$0xff]  ;;  %v1995_v47 = vadd.f32 %v1980_v31, %v1972_v41  ;;  %1998 = vst [vmem:[#allocation12] sm:$0xff] %v1992_v44 }
 0x2fd   : > { %v1971_v33 = vld [vmem:[#allocation2 + $0x10] sm:$0xff]  ;;  %v1996_v48 = vadd.f32 %v1984_v32, %v1973_v42  ;;  %1999 = vst [vmem:[#allocation12 + $0x8] sm:$0xff] %v1993_v45 }
 0x2fe   : > { %v1994_v46 = vadd.f32 %v1988_v40, %v1971_v33  ;;  %2001 = vst [vmem:[#allocation12 + $0x18] sm:$0xff] %v1995_v47 }
 0x2ff   : > { %v1974_v43 = vld [vmem:[#allocation2 + $0x28] sm:$0xff]  ;;  %2002 = vst [vmem:[#allocation12 + $0x20] sm:$0xff] %v1996_v48 }
 0x300   : > { %v1997_v3 = vadd.f32 %v1988_v40, %v1974_v43  ;;  %2000 = vst [vmem:[#allocation12 + $0x10] sm:$0xff] %v1994_v46 }
 0x302   : > { %2003 = vst [vmem:[#allocation12 + $0x28] sm:$0xff] %v1997_v3 }
 0x303 PF: > { %p2452_p13 = scmp.eq.s32.totalorder %s3062_s22, 2  ;;  %s3010_s28 = smov [#allocation12]  }
 0x304   : > { %s2010_s1 = sshll.u32 %s3010_s28, 4  ;;  %s2011_s1 = int_to_ptr.vmem [resolvable:$true] %s2010_s1 }
 0x305   : > { %s2918_s11 = scalar_lea.vmem %s2011_s1, 768  ;;  %p2925_p12 = scmp.lt.s32.totalorder %s2011_s1, %s2011_s1 }
 0x306   : > { %p2919_p4 = scmp.ne.s32.totalorder %s2011_s1, %s2918_s11  ;;  %p2926_p5 = scmp.lt.s32.totalorder %s2918_s11, %s2918_s11 }
 0x308   : > { %p2920_p2 = pnand %p2919_p4, %p2452_p13  ;;  %p2927_p9 = por %p2926_p5, %p2925_p12 }
 0x30a   : > { %p2921_p7 = pneg %p2920_p2 }
 0x30c   : > { %p2928_p11 = pnand %p2927_p9, %p2921_p7 }
 0x30e   : > { %2931 = shalt.err (!%p2928_p11)
}
 0x30f   : > { %s2932_s27 = scalar_lea.hbm %s3555_s5, 768 }
 0x310   : > { %p2933_p10 = scmp.ne.s32.totalorder %s3555_s5, %s2932_s27  ;;  %p2938_p3 = scmp.lt.u32.totalorder %s2932_s27, %s3555_s5 }
 0x312   : > { %p2934_p1 = pnand %p2933_p10, %p2452_p13 }
 0x314   : > { %p2935_p6 = pneg %p2934_p1 }
 0x316   : > { %p2940_p0 = pnand %p2938_p3, %p2935_p6 }
 0x318   : > { %2943 = shalt.err (!%p2940_p0)
}
 0x319   : > { %s3011_s12 = smov 384   ;;  %s3012_s13 = smov 24  }
 0x31a   : > { %2427 = dma.vmem_to_hbm [thread:$0]  (%p2452_p13), %s2011_s1, 768, %s3555_s5, [#allocation5], %s3011_s12, %s3011_s12, %s3012_s13  }
 0x31b   : > { %2977 = dma.done.wait (%p2452_p13), [#allocation5], 768  }
 0x31c   : > { %2979 = vsyncadd (%p2452_p13), [#allocation5], 4294966528 }
 0x31d PF: > { %p20_p8 = scmp.ge.s32.totalorder %s3065_s23, 5   ;;  %s3593_s18 = smov %s2986_s19 }
 0x31e   : > { %s3594_s19 = smov %s2990_s20  ;;  %s3595_s20 = smov %s3075_s26 }
 0x31f   : > { %s3596_s21 = smov %s3065_s23  ;;  %22 = sbr.rel (!%p20_p8) target bundleno = 10 (0xa), region = 118 }
 0x326   :  { %2026 = vsyncpa [#allocation4], 1 }
 0x327   :  { %2028 = vsyncpa [#allocation4 + $0x1], 1 }
 0x328   :  { %2029 = vsyncpa [#allocation7], 1 }
 0x329   :  { %2031 = vsyncpa [#allocation7 + $0x1], 1 }
 0x32a   :  { %2032 = vsyncpa [#allocation10], 1 }
 0x32b   :  { %2034 = vsyncpa [#allocation10 + $0x1], 1 }
 0x32c   :  { %2035 = vsyncpa [#allocation5], 1 }
 0x32d   :  { %2037 = vsyncpa [#allocation5 + $0x1], 1 }

</bundles_post_ra>
